<compile_context>
chip_gen: v7x
topology: tpu7x:2x2x1
jax: 0.10.0
libtpu: 0.0.40
codegen_flags: <defaults>
</compile_context>

<pallas_src>
import functools

import jax
import jax.numpy as jnp
from jax import lax
from jax.experimental import pallas as pl
from jax.experimental.pallas import tpu as pltpu


def _round_up(x, m):
    return (x + m - 1) // m * m


def _attn_kernel(x_ref, wq_ref, wkv_ref, wo_ref, bo_ref,
                 out_ref, attn_ref, acc_ref, *,
                 scale, tq, dh_p, n_valid, n_padded):
    # x_ref   : (1, n_p, di_p)     full (padded) token slab, resident per batch
    # wq_ref  : (1, di_p, dh_p)    per-head Q projection
    # wkv_ref : (1, di_p, 2*dh_p)  per-head fused [K | V] projection
    # wo_ref  : (1, dh_p, do_p)    per-head slice of the output projection
    # bo_ref  : (1, do_p)
    # out_ref : (1, tq, do_p)      resident across the head axis (accumulator)
    # attn_ref: (1, 1, tq, n_p)
    # acc_ref : (tq, do_p) fp32 VMEM scratch
    i = pl.program_id(1)
    h = pl.program_id(2)

    x_all = x_ref[0]                                      # (n_p, di_p)
    if tq == n_padded:                                    # static: single q tile
        xq = x_all
    else:
        q_start = pl.multiple_of(i * tq, 8)
        xq = x_ref[0, pl.ds(q_start, tq), :]              # (tq, di_p)

    # Per-head projections (all lane-dense).
    q = jnp.dot(xq, wq_ref[0], preferred_element_type=jnp.float32) * scale
    kv = jnp.dot(x_all, wkv_ref[0], preferred_element_type=jnp.float32)
    k = kv[:, :dh_p]                                      # (n_p, dh_p)
    v = kv[:, dh_p:]                                      # (n_p, dh_p)

    # q @ k^T without an explicit transpose (contract on the head dim).
    dots = lax.dot_general(q, k, (((1,), (1,)), ((), ())),
                           preferred_element_type=jnp.float32)   # (tq, n_p)

    if n_padded > n_valid:                                # static: mask pad keys
        key_ids = lax.broadcasted_iota(jnp.int32, dots.shape, 1)
        dots = jnp.where(key_ids < n_valid, dots, -1e30)

    # softmax (exact division to keep 1e-5 parity with the reference;
    # pl.reciprocal(approx=True) is a faster EUP alternative if tolerable).
    m = jnp.max(dots, axis=-1, keepdims=True)
    e = jnp.exp(dots - m)
    s = jnp.sum(e, axis=-1, keepdims=True)
    attn = e / s

    attn_ref[0, 0] = attn.astype(attn_ref.dtype)

    o = jnp.dot(attn, v, preferred_element_type=jnp.float32)             # (tq, dh_p)
    partial = jnp.dot(o, wo_ref[0], preferred_element_type=jnp.float32)  # (tq, do_p)

    @pl.when(h == 0)
    def _():
        acc_ref[...] = jnp.zeros_like(acc_ref)

    acc_ref[...] += partial

    @pl.when(h == pl.num_programs(2) - 1)
    def _():
        out_ref[0] = (acc_ref[...] + bo_ref[...]).astype(out_ref.dtype)


@functools.partial(jax.jit, static_argnames=("heads", "dim_head"))
def attention1d(x, w_qkv, w_out, b_out, *, heads, dim_head):
    """x: (B, N, dim_in); w_qkv: (dim_in, 3*heads*dim_head) [q|k|v];
    w_out: (heads*dim_head, dim_out); b_out: (dim_out,).
    Returns (out (B, N, dim_out), attn (B, heads, N, N))."""
    B, N, dim_in = x.shape
    dim_out = w_out.shape[1]
    scale = float(dim_head) ** -0.5

    # Token-axis padding / query tiling.
    if N <= 256:
        # Single query tile, minimal (sublane) padding -> tiny attn writeback.
        tq = _round_up(N, 8)
        n_p = tq
    else:
        # Lane-dense key axis for long sequences; largest tile <= 512 dividing it.
        n_p = _round_up(N, 128)
        tq = 512
        while n_p % tq:
            tq -= 128
    n_i = n_p // tq

    # Lane-dense feature padding (zero pad -> mathematically exact).
    di_p = _round_up(dim_in, 128)
    dh_p = _round_up(dim_head, 128)
    do_p = _round_up(dim_out, 128)

    wq, wk, wv = jnp.split(w_qkv, 3, axis=-1)         # each (dim_in, heads*dim_head)

    def per_head(w):                                   # -> (heads, di_p, dh_p)
        w = w.reshape(dim_in, heads, dim_head).transpose(1, 0, 2)
        return jnp.pad(w, ((0, 0), (0, di_p - dim_in), (0, dh_p - dim_head)))

    wq_p = per_head(wq)
    wkv_p = jnp.concatenate([per_head(wk), per_head(wv)], axis=-1)  # (heads, di_p, 2*dh_p)

    wo_p = jnp.pad(w_out.reshape(heads, dim_head, dim_out),
                   ((0, 0), (0, dh_p - dim_head), (0, do_p - dim_out)))
    bo_p = jnp.pad(b_out.reshape(1, dim_out), ((0, 0), (0, do_p - dim_out)))
    x_p = jnp.pad(x, ((0, 0), (0, n_p - N), (0, di_p - dim_in)))

    grid = (B, n_i, heads)

    flops = 2 * B * n_i * heads * (
        tq * di_p * dh_p              # q projection
        + n_p * di_p * 2 * dh_p       # fused k,v projection
        + 2 * tq * n_p * dh_p         # dots + attn @ v
        + tq * dh_p * do_p)           # per-head output projection
    transcendentals = B * n_i * heads * tq * n_p
    bytes_accessed = 4 * (B * n_p * di_p                            # x (once per batch)
                          + B * n_i * heads * di_p * 3 * dh_p       # Wq + Wkv re-reads
                          + B * n_i * heads * dh_p * do_p           # Wo re-reads
                          + B * n_p * do_p                          # out
                          + B * heads * n_p * n_p)                  # attn

    out_p, attn_p = pl.pallas_call(
        functools.partial(_attn_kernel, scale=scale, tq=tq, dh_p=dh_p,
                          n_valid=N, n_padded=n_p),
        out_shape=(
            jax.ShapeDtypeStruct((B, n_p, do_p), x.dtype),
            jax.ShapeDtypeStruct((B, heads, n_p, n_p), x.dtype),
        ),
        grid_spec=pltpu.PrefetchScalarGridSpec(
            num_scalar_prefetch=0,
            grid=grid,
            in_specs=[
                pl.BlockSpec((1, n_p, di_p), lambda b, i, h: (b, 0, 0)),       # x slab
                pl.BlockSpec((1, di_p, dh_p), lambda b, i, h: (h, 0, 0)),      # Wq[h]
                pl.BlockSpec((1, di_p, 2 * dh_p), lambda b, i, h: (h, 0, 0)),  # [Wk|Wv][h]
                pl.BlockSpec((1, dh_p, do_p), lambda b, i, h: (h, 0, 0)),      # Wo[h]
                pl.BlockSpec((1, do_p), lambda b, i, h: (0, 0)),               # b_out
            ],
            out_specs=[
                pl.BlockSpec((1, tq, do_p), lambda b, i, h: (b, i, 0)),        # out
                pl.BlockSpec((1, 1, tq, n_p), lambda b, i, h: (b, h, i, 0)),   # attn
            ],
            scratch_shapes=[pltpu.VMEM((tq, do_p), jnp.float32)],
        ),
        compiler_params=pltpu.CompilerParams(
            dimension_semantics=("parallel", "parallel", "arbitrary"),
            vmem_limit_bytes=32 * 1024 * 1024,
        ),
        cost_estimate=pl.CostEstimate(
            flops=int(flops),
            transcendentals=int(transcendentals),
            bytes_accessed=int(bytes_accessed),
        ),
    )(x_p, wq_p, wkv_p, wo_p, bo_p)

    out = out_p[:, :N, :dim_out]
    attn = attn_p[:, :, :N, :N]
    return out, attn


def _reference(x, w_qkv, w_out, b_out, heads, dim_head):
    B, N, _ = x.shape
    inner = heads * dim_head
    qkv = jnp.einsum("bnc,ck->bnk", x, w_qkv)
    q, k, v = jnp.split(qkv, 3, axis=-1)

    def split_heads(t):
        return t.reshape(B, N, heads, dim_head).transpose(0, 2, 1, 3)

    q, k, v = map(split_heads, (q, k, v))
    dots = jnp.einsum("bhid,bhjd->bhij", q, k) * (dim_head ** -0.5)
    attn = jax.nn.softmax(dots, axis=-1)
    out = jnp.einsum("bhij,bhjd->bhid", attn, v)
    out = out.transpose(0, 2, 1, 3).reshape(B, N, inner)
    out = jnp.einsum("bnk,ko->bno", out, w_out) + b_out
    return out, attn


if __name__ == "__main__":
    # Attention1d(dim_in=16) with defaults heads=8, dim_head=64, dropout=0.
    B, N, dim_in = 2, 8, 16
    heads, dim_head = 8, 64
    inner = heads * dim_head
    dim_out = dim_in

    key = jax.random.PRNGKey(0)
    kx, kqkv, kwo, kbo = jax.random.split(key, 4)

    x = jax.random.normal(kx, (B, N, dim_in), dtype=jnp.float32)

    # Deterministic init mimicking nn.Linear uniform(-1/sqrt(fan_in), +)
    lim_qkv = 1.0 / jnp.sqrt(dim_in)
    lim_out = 1.0 / jnp.sqrt(inner)
    w_qkv = jax.random.uniform(kqkv, (dim_in, 3 * inner), jnp.float32,
                               -lim_qkv, lim_qkv)
    w_out = jax.random.uniform(kwo, (inner, dim_out), jnp.float32,
                               -lim_out, lim_out)
    b_out = jax.random.uniform(kbo, (dim_out,), jnp.float32, -lim_out, lim_out)

    out, attn = attention1d(x, w_qkv, w_out, b_out, heads=heads,
                            dim_head=dim_head)
    out = jax.block_until_ready(out)
    attn = jax.block_until_ready(attn)

    ref_out, ref_attn = _reference(x, w_qkv, w_out, b_out, heads, dim_head)
    assert out.shape == (B, N, dim_out)
    assert attn.shape == (B, heads, N, N)
    assert jnp.allclose(out, ref_out, atol=1e-5, rtol=1e-5), "out mismatch"
    assert jnp.allclose(attn, ref_attn, atol=1e-5, rtol=1e-5), "attn mismatch"

    print("KERNEL_OK")
</pallas_src>

<mosaic_0001>
module attributes {stable_mosaic.version = 11 : i64} {
  func.func @_attn_kernel(%arg0: i32, %arg1: i32, %arg2: i32, %arg3: memref<1x8x128xf32, #tpu.memory_space<vmem>>, %arg4: memref<1x128x128xf32, #tpu.memory_space<vmem>>, %arg5: memref<1x128x256xf32, #tpu.memory_space<vmem>>, %arg6: memref<1x128x128xf32, #tpu.memory_space<vmem>>, %arg7: memref<1x128xf32, #tpu.memory_space<vmem>>, %arg8: memref<1x8x128xf32, #tpu.memory_space<vmem>>, %arg9: memref<1x1x8x8xf32, #tpu.memory_space<vmem>>, %arg10: memref<8x128xf32, #tpu.memory_space<vmem>>) attributes {dimension_semantics = [#tpu.dimension_semantics<parallel>, #tpu.dimension_semantics<parallel>, #tpu.dimension_semantics<arbitrary>], iteration_bounds = array<i64: 2, 1, 8>, scalar_prefetch = 0 : i64, scratch_operands = 1 : i64, tpu.core_type = #tpu.core_type<tc>, window_params = [{transform_indices = @transform_0, window_bounds = array<i64: 1, 8, 128>}, {transform_indices = @transform_1, window_bounds = array<i64: 1, 128, 128>}, {transform_indices = @transform_2, window_bounds = array<i64: 1, 128, 256>}, {transform_indices = @transform_3, window_bounds = array<i64: 1, 128, 128>}, {pipeline_mode = #tpu.pipeline_mode<synchronous>, transform_indices = @transform_4, window_bounds = array<i64: 1, 128>}, {transform_indices = @transform_5, window_bounds = array<i64: 1, 8, 128>}, {transform_indices = @transform_6, window_bounds = array<i64: 1, 1, 8, 8>}]} {
    %c0 = arith.constant 0 : index
    %c0_0 = arith.constant 0 : index
    %c0_1 = arith.constant 0 : index
    %0 = vector.load %arg3[%c0, %c0_0, %c0_1] : memref<1x8x128xf32, #tpu.memory_space<vmem>>, vector<1x8x128xf32>
    %1 = vector.shape_cast %0 : vector<1x8x128xf32> to vector<8x128xf32>
    %c0_2 = arith.constant 0 : index
    %c0_3 = arith.constant 0 : index
    %c0_4 = arith.constant 0 : index
    %2 = vector.load %arg4[%c0_2, %c0_3, %c0_4] : memref<1x128x128xf32, #tpu.memory_space<vmem>>, vector<1x128x128xf32>
    %3 = vector.shape_cast %2 : vector<1x128x128xf32> to vector<128x128xf32>
    %cst = arith.constant dense<0.000000e+00> : vector<8x128xf32>
    %4 = tpu.matmul %1, %3, %cst {dimension_numbers = #tpu.dot_dimension_numbers<[1], [0], [0], [1], [0, 0, 1, 1], [], []>} : vector<8x128xf32>, vector<128x128xf32>, vector<8x128xf32> -> vector<8x128xf32>
    %cst_5 = arith.constant 1.250000e-01 : f32
    %5 = vector.broadcast %cst_5 : f32 to vector<8x128xf32>
    %6 = arith.mulf %4, %5 : vector<8x128xf32>
    %c0_6 = arith.constant 0 : index
    %c0_7 = arith.constant 0 : index
    %c0_8 = arith.constant 0 : index
    %7 = vector.load %arg5[%c0_6, %c0_7, %c0_8] : memref<1x128x256xf32, #tpu.memory_space<vmem>>, vector<1x128x256xf32>
    %8 = vector.shape_cast %7 : vector<1x128x256xf32> to vector<128x256xf32>
    %cst_9 = arith.constant dense<0.000000e+00> : vector<8x256xf32>
    %9 = tpu.matmul %1, %8, %cst_9 {dimension_numbers = #tpu.dot_dimension_numbers<[1], [0], [0], [1], [0, 0, 1, 1], [], []>} : vector<8x128xf32>, vector<128x256xf32>, vector<8x256xf32> -> vector<8x256xf32>
    %10 = vector.extract_strided_slice %9 {offsets = [0, 0], sizes = [8, 128], strides = [1, 1]} : vector<8x256xf32> to vector<8x128xf32>
    %11 = vector.extract_strided_slice %9 {offsets = [0, 128], sizes = [8, 128], strides = [1, 1]} : vector<8x256xf32> to vector<8x128xf32>
    %cst_10 = arith.constant dense<0.000000e+00> : vector<8x8xf32>
    %12 = tpu.matmul %6, %10, %cst_10 {dimension_numbers = #tpu.dot_dimension_numbers<[1], [1], [0], [0], [0, 0, 1, 0], [], []>} : vector<8x128xf32>, vector<8x128xf32>, vector<8x8xf32> -> vector<8x8xf32>
    %cst_11 = arith.constant dense<0xFF800000> : vector<8xf32>
    %13 = vector.multi_reduction <maximumf>, %12, %cst_11 [1] : vector<8x8xf32> to vector<8xf32>
    %14 = vector.shape_cast %13 : vector<8xf32> to vector<8x1xf32>
    %15 = vector.broadcast %14 : vector<8x1xf32> to vector<8x8xf32>
    %16 = arith.subf %12, %15 : vector<8x8xf32>
    %17 = math.exp %16 : vector<8x8xf32>
    %cst_12 = arith.constant dense<0.000000e+00> : vector<8xf32>
    %18 = vector.multi_reduction <add>, %17, %cst_12 [1] : vector<8x8xf32> to vector<8xf32>
    %19 = vector.shape_cast %18 : vector<8xf32> to vector<8x1xf32>
    %20 = vector.broadcast %19 : vector<8x1xf32> to vector<8x8xf32>
    %21 = arith.divf %17, %20 : vector<8x8xf32>
    %c0_13 = arith.constant 0 : index
    %c0_14 = arith.constant 0 : index
    %c0_15 = arith.constant 0 : index
    %c0_16 = arith.constant 0 : index
    %22 = vector.load %arg9[%c0_13, %c0_14, %c0_15, %c0_16] : memref<1x1x8x8xf32, #tpu.memory_space<vmem>>, vector<1x1x8x8xf32>
    %23 = vector.shape_cast %22 : vector<1x1x8x8xf32> to vector<8x8xf32>
    %24 = vector.shape_cast %21 : vector<8x8xf32> to vector<1x1x8x8xf32>
    tpu.vector_store %arg9[%c0_13, %c0_14, %c0_15, %c0_16], %24 {strides = array<i32>} : memref<1x1x8x8xf32, #tpu.memory_space<vmem>>, vector<1x1x8x8xf32>,
    %cst_17 = arith.constant dense<0.000000e+00> : vector<8x128xf32>
    %25 = tpu.matmul %21, %11, %cst_17 {dimension_numbers = #tpu.dot_dimension_numbers<[1], [0], [0], [1], [0, 0, 1, 1], [], []>} : vector<8x8xf32>, vector<8x128xf32>, vector<8x128xf32> -> vector<8x128xf32>
    %c0_18 = arith.constant 0 : index
    %c0_19 = arith.constant 0 : index
    %c0_20 = arith.constant 0 : index
    %26 = vector.load %arg6[%c0_18, %c0_19, %c0_20] : memref<1x128x128xf32, #tpu.memory_space<vmem>>, vector<1x128x128xf32>
    %27 = vector.shape_cast %26 : vector<1x128x128xf32> to vector<128x128xf32>
    %cst_21 = arith.constant dense<0.000000e+00> : vector<8x128xf32>
    %28 = tpu.matmul %25, %27, %cst_21 {dimension_numbers = #tpu.dot_dimension_numbers<[1], [0], [0], [1], [0, 0, 1, 1], [], []>} : vector<8x128xf32>, vector<128x128xf32>, vector<8x128xf32> -> vector<8x128xf32>
    %c0_i32 = arith.constant 0 : i32
    %29 = arith.cmpi eq, %arg2, %c0_i32 : i32
    %30 = arith.extui %29 : i1 to i32
    %c0_i32_22 = arith.constant 0 : i32
    %31 = arith.cmpi ne, %30, %c0_i32_22 : i32
    scf.if %31 {
      %cst_28 = arith.constant 0.000000e+00 : f32
      %38 = vector.broadcast %cst_28 : f32 to vector<8x128xf32>
      %c0_29 = arith.constant 0 : index
      %c0_30 = arith.constant 0 : index
      %39 = vector.load %arg10[%c0_29, %c0_30] : memref<8x128xf32, #tpu.memory_space<vmem>>, vector<8x128xf32>
      tpu.vector_store %arg10[%c0_29, %c0_30], %38 {strides = array<i32>} : memref<8x128xf32, #tpu.memory_space<vmem>>, vector<8x128xf32>,
    } else {
    }
    %c0_23 = arith.constant 0 : index
    %c0_24 = arith.constant 0 : index
    %32 = vector.load %arg10[%c0_23, %c0_24] : memref<8x128xf32, #tpu.memory_space<vmem>>, vector<8x128xf32>
    %33 = arith.addf %32, %28 : vector<8x128xf32>
    %c0_25 = arith.constant 0 : index
    %c0_26 = arith.constant 0 : index
    %34 = vector.load %arg10[%c0_25, %c0_26] : memref<8x128xf32, #tpu.memory_space<vmem>>, vector<8x128xf32>
    tpu.vector_store %arg10[%c0_25, %c0_26], %33 {strides = array<i32>} : memref<8x128xf32, #tpu.memory_space<vmem>>, vector<8x128xf32>,
    %c7_i32 = arith.constant 7 : i32
    %35 = arith.cmpi eq, %arg2, %c7_i32 : i32
    %36 = arith.extui %35 : i1 to i32
    %c0_i32_27 = arith.constant 0 : i32
    %37 = arith.cmpi ne, %36, %c0_i32_27 : i32
    scf.if %37 {
      %c0_28 = arith.constant 0 : index
      %c0_29 = arith.constant 0 : index
      %38 = vector.load %arg10[%c0_28, %c0_29] : memref<8x128xf32, #tpu.memory_space<vmem>>, vector<8x128xf32>
      %c0_30 = arith.constant 0 : index
      %c0_31 = arith.constant 0 : index
      %39 = vector.load %arg7[%c0_30, %c0_31] : memref<1x128xf32, #tpu.memory_space<vmem>>, vector<1x128xf32>
      %40 = vector.broadcast %39 : vector<1x128xf32> to vector<8x128xf32>
      %41 = arith.addf %38, %40 : vector<8x128xf32>
      %c0_32 = arith.constant 0 : index
      %c0_33 = arith.constant 0 : index
      %c0_34 = arith.constant 0 : index
      %42 = vector.load %arg8[%c0_32, %c0_33, %c0_34] : memref<1x8x128xf32, #tpu.memory_space<vmem>>, vector<1x8x128xf32>
      %43 = vector.shape_cast %42 : vector<1x8x128xf32> to vector<8x128xf32>
      %44 = vector.shape_cast %41 : vector<8x128xf32> to vector<1x8x128xf32>
      tpu.vector_store %arg8[%c0_32, %c0_33, %c0_34], %44 {strides = array<i32>} : memref<1x8x128xf32, #tpu.memory_space<vmem>>, vector<1x8x128xf32>,
    } else {
    }
    return
  }
  func.func @transform_0(%arg0: i32, %arg1: i32, %arg2: i32) -> (i32, i32, i32) {
    %c0_i32 = arith.constant 0 : i32
    %c0_i32_0 = arith.constant 0 : i32
    %c0_i32_1 = arith.constant 0 : i32
    return %arg0, %c0_i32, %c0_i32_0 : i32, i32, i32
  }
  func.func @transform_1(%arg0: i32, %arg1: i32, %arg2: i32) -> (i32, i32, i32) {
    %c0_i32 = arith.constant 0 : i32
    %c0_i32_0 = arith.constant 0 : i32
    %c0_i32_1 = arith.constant 0 : i32
    return %arg2, %c0_i32, %c0_i32_0 : i32, i32, i32
  }
  func.func @transform_2(%arg0: i32, %arg1: i32, %arg2: i32) -> (i32, i32, i32) {
    %c0_i32 = arith.constant 0 : i32
    %c0_i32_0 = arith.constant 0 : i32
    %c0_i32_1 = arith.constant 0 : i32
    return %arg2, %c0_i32, %c0_i32_0 : i32, i32, i32
  }
  func.func @transform_3(%arg0: i32, %arg1: i32, %arg2: i32) -> (i32, i32, i32) {
    %c0_i32 = arith.constant 0 : i32
    %c0_i32_0 = arith.constant 0 : i32
    %c0_i32_1 = arith.constant 0 : i32
    return %arg2, %c0_i32, %c0_i32_0 : i32, i32, i32
  }
  func.func @transform_4(%arg0: i32, %arg1: i32, %arg2: i32) -> (i32, i32) {
    %c0_i32 = arith.constant 0 : i32
    %c0_i32_0 = arith.constant 0 : i32
    %c0_i32_1 = arith.constant 0 : i32
    return %c0_i32, %c0_i32_0 : i32, i32
  }
  func.func @transform_5(%arg0: i32, %arg1: i32, %arg2: i32) -> (i32, i32, i32) {
    %c0_i32 = arith.constant 0 : i32
    %c0_i32_0 = arith.constant 0 : i32
    return %arg0, %arg1, %c0_i32 : i32, i32, i32
  }
  func.func @transform_6(%arg0: i32, %arg1: i32, %arg2: i32) -> (i32, i32, i32, i32) {
    %c0_i32 = arith.constant 0 : i32
    %c0_i32_0 = arith.constant 0 : i32
    return %arg0, %arg2, %arg1, %c0_i32 : i32, i32, i32, i32
  }
}

</mosaic_0001>

<bundles_post_ra>
// kernel: attention1d.1
= control target key start
LH: loop header
LB: loop body
LE: loop exit
PB: predicated region body
PF: predicated region fallthrough
CT: control target
= control target key end

     0   :  { %s1862_s0 = inlined_call_operand.vmem [shape: f32[2,8,128], index: 0, kind: input, shape index: {}]   ;;  %s1863_s1 = inlined_call_operand.vmem [shape: f32[8,128,128], index: 1, kind: input, shape index: {}]   ;;  %s1864_s2 = inlined_call_operand.vmem [shape: f32[8,128,256], index: 2, kind: input, shape index: {}]   ;;  %s1865_s3 = inlined_call_operand.vmem [shape: f32[8,128,128], index: 3, kind: input, shape index: {}]   ;;  %s1866_s4 = inlined_call_operand.vmem [shape: f32[1,128], index: 4, kind: input, shape index: {}]   ;;  %s1867_s5 = inlined_call_operand.hbm [shape: f32[2,8,128], index: 5, kind: output, shape index: {0}]   ;;  %s1868_s6 = inlined_call_operand.hbm [shape: f32[2,8,8,8], index: 6, kind: output, shape index: {1}]  }
   0x1   :  { %1876 = sst [smem:[#allocation14_spill]] %s1862_s0 }
   0x2   :  { %1877 = sst [smem:[#allocation15_spill]] %s1863_s1 }
   0x3   :  { %1878 = sst [smem:[#allocation16_spill]] %s1864_s2 }
   0x4   :  { %1879 = sst [smem:[#allocation17_spill]] %s1865_s3 }
   0x5   :  { %12 = vsyncpa [#allocation4], 0 }
   0x6   :  { %14 = vsyncpa [#allocation4 + $0x1], 0 }
   0x7   :  { %15 = vsyncpa [#allocation6], 0 }
   0x8   :  { %17 = vsyncpa [#allocation6 + $0x1], 0  ;;  %s1506_s21 = smov 0   ;;  %s1508_s22 = smov 0  }
   0x9   :  { %s1510_s23 = smov 0   ;;  %s1512_s24 = smov 0  }
   0xa   :  { %s1514_s25 = smov 0   ;;  %s1516_s26 = smov 0  }
   0xb   :  { %s1518_s27 = smov 0   ;;  %s1520_s28 = smov 0  }
   0xc   :  { %s1522_s29 = smov 0   ;;  %s1524_s30 = smov 0  }
   0xd   :  { %s1526_s7 = smov 0  }
   0xe LB: > { %1880 = sst [smem:[#allocation9_spill]] %s1455_s29  ;;  %s979_s8 = sadd.s32 4294967295, %s1463_s7   ;;  %s1463_s7 = sphi %s1526_s7, %s23_s7   ;;  %s1459_s30 = sphi %s1524_s30, %s1903_s30   ;;  %s1455_s29 = sphi %s1522_s29, %s1902_s29   ;;  %s1451_s28 = sphi %s1520_s28, %s1901_s28   ;;  %s1447_s27 = sphi %s1518_s27, %s1900_s27   ;;  %s1443_s26 = sphi %s1516_s26, %s1909_s26   ;;  %s1439_s25 = sphi %s1514_s25, %s1908_s25   ;;  %s1435_s24 = sphi %s1512_s24, %s1907_s24   ;;  %s1431_s23 = sphi %s1510_s23, %s1906_s23   ;;  %s1427_s22 = sphi %s1508_s22, %s1905_s22   ;;  %s1423_s21 = sphi %s1506_s21, %s1904_s21  }
   0xf   : > { %1881 = sst [smem:[#allocation10_spill]] %s1459_s30  ;;  %s980_s9 = sadd.s32 4294967294, %s1463_s7  }
  0x10   : > { %s35_s10 = sadd.s32 1, %s1455_s29  ;;  %s42_s11 = sadd.s32 1, %s1459_s30 }
  0x11   : > { %p36_p0 = scmp.ge.s32.totalorder %s35_s10, 8  ;;  %s176_s12 = sadd.s32 1, %s1443_s26 }
  0x12   : > { %p186_p1 = scmp.ne.s32.totalorder %s1443_s26, %s1439_s25  ;;  %p1568_p2 = scmp.eq.s32.totalorder %s979_s8, 15 }
  0x13   : > { %s1911_s10 = smov (%p36_p0, %s35_s10), 0  ;;  %s1913_s11 = smov (!%p36_p0, %s42_s11), %s1459_s30 }
  0x14   : > { %1883 = sst [smem:[#allocation11_spill]] %s1911_s10  ;;  %p1577_p3 = por %p1568_p2, %p186_p1 }
  0x15   : > { %p192_p4 = scmp.ne.s32.totalorder %s1439_s25, %s1435_s24  ;;  %p44_p5 = scmp.ge.s32.totalorder %s1913_s11, 2 }
  0x16   : > { %p1583_p6 = scmp.eq.s32.totalorder %s980_s9, 15  ;;  %s200_s16 = ssub.s32 %s1455_s29, %s1911_s10 }
  0x17   : > { %s206_s17 = sadd.s32 1, %s1431_s23  ;;  %s1915_s11 = smov (%p44_p5, %s1913_s11), 0 }
  0x18   : > { %1886 = sst [smem:[#allocation12_spill]] %s1915_s11  ;;  %p1594_p7 = por %p1583_p6, %p192_p4 }
  0x19   : > { %p216_p8 = scmp.ne.s32.totalorder %s1431_s23, %s1427_s22  ;;  %s171_s19 = ssub.s32 %s1459_s30, %s1915_s11 }
  0x1a   : > { %p222_p9 = scmp.ne.s32.totalorder %s1427_s22, %s1423_s21  ;;  %p174_p10 = scmp.eq.s32.totalorder %s171_s19, 0 }
  0x1b   : > { %s201_s20 = sor.u32 %s200_s16, %s171_s19  ;;  %p1606_p12 = por %p216_p8, %p1568_p2 }
  0x1c   : > { %p204_p11 = scmp.eq.s32.totalorder %s201_s20, 0  ;;  %p1618_p13 = por %p222_p9, %p1583_p6 }
  0x1d   : > { %s1611_s9 = scalar_select %p174_p10, %s1443_s26, %s176_s12  }
  0x1e   : > { %s1614_s10 = scalar_select %p204_p11, %s1431_s23, %s206_s17  }
  0x1f   : > { %1889 = sst [smem:[#allocation13_spill]] %s1611_s9  ;;  %p983_p0 = scmp.ge.s32.totalorder %s1463_s7, 1 }
  0x20   : > { %s1890_s29 = scalar_select %p1618_p13, 1, 0 }
  0x21   : > { %p275_p1 = scmp.lt.s32.totalorder %s1463_s7, 17 }
  0x23   : > { %p276_p4 = pnand %p983_p0, %p275_p1 }
  0x24   : > { %p328_p2 = scmp.lt.s32.totalorder (!%p276_p4), %s1447_s27, 7  ;;  %s1871_s13 = sand.u32 (!%p276_p4), 1, %s1439_s25   ;;  %v1465_v0 = vmov (!%p276_p4), 0.0|0.0   ;;  %v1466_v1 = vmov (!%p276_p4), 0.0   ;;  %vm1467_vm0 = vmmov (!%p276_p4), 0   ;;  %vm604_vm1 = vcmask (!%p276_p4), 64512  }
  0x25   : > { %279 = sbr.rel (%p276_p4) target bundleno = 1314 (0x522), region = 40  ;;  %s1628_s12 = sshll.u32 (!%p276_p4), %s1871_s13, 3  ;;  %1125 = vmatprep.subr.bf16.mxu0 (!%p276_p4), %v1465_v0  ;;  %527 = vmatprep.mubr.f32.mxu1 (!%p276_p4), %v1466_v1 }
  0x26   : > { %1077 = vmatprep.mubr.msk.f32.mxu0 (!%p276_p4), %vm1467_vm0, %v1466_v1  ;;  %s1891_s2 = sld [smem:[#allocation16_spill]] (!%p276_p4)  ;;  %s1892_s1 = sld [smem:[#allocation15_spill]] (!%p276_p4) }
  0x27   : > { %p324_p5 = scmp.lt.s32.totalorder (!%p276_p4), %s1451_s28, 1  ;;  %s1893_s0 = sld [smem:[#allocation14_spill]] (!%p276_p4) }
  0x28   : > { %s1894_s3 = sld [smem:[#allocation17_spill]] (!%p276_p4)  ;;  %p994_p6 = scmp.ne.s32.totalorder (!%p276_p4), %s1447_s27, 0 }
  0x2c   : > { %s1633_s15 = scalar_select %p328_p2, %s1447_s27, 7 }
  0x2d   : > { %s325_s30 = scalar_select %p324_p5, %s1451_s28, 1 }
  0x2e   : > { %s1005_s16 = sshll.u32 %s1633_s15, 8  ;;  %s1004_s17 = sshll.u32 %s1633_s15, 7 }
  0x2f   : > { %s1642_s13 = scalar_lea.vmem %s1891_s2, %s1005_s16  ;;  %s1649_s9 = scalar_lea.vmem %s1892_s1, %s1004_s17 }
  0x30   : > { %v432_v2 = vld [vmem:[%s1642_s13 + $0x8] sm:$0xff]  ;;  %v434_v3 = vld [vmem:[%s1642_s13 + $0x18] sm:$0xff]  ;;  %v431_v4 = vld [vmem:[%s1642_s13] sm:$0xff]  ;;  %s986_s11 = sshll.u32 %s325_s30, 3  ;;  %s1729_s30 = scalar_lea.vmem %s1894_s3, %s1004_s17 }
  0x31   : > { %v1149_v5 = vpack.c.bf16 %v434_v3, %v432_v2  ;;  %v433_v6 = vld [vmem:[%s1642_s13 + $0x10] sm:$0xff]  ;;  %v344_v7 = vld [vmem:[%s1649_s9] sm:$0xff]  ;;  %v345_v8 = vld [vmem:[%s1649_s9 + $0x8] sm:$0xff]  ;;  %s327_s20 = scalar_lea.vmem %s1893_s0, %s986_s11  ;;  %s1874_s15 = sand.u32 1, %s1427_s22  }
  0x32   : > { %v1151_v9 = vpack.c.bf16 %v433_v6, %v431_v4  ;;  %v1126_v10 = vpack.c.bf16 %v345_v8, %v344_v7  ;;  %v436_v11 = vld [vmem:[%s1642_s13 + $0x28] sm:$0xff]  ;;  %v438_v12 = vld [vmem:[%s1642_s13 + $0x38] sm:$0xff]  ;;  %v435_v13 = vld [vmem:[%s1642_s13 + $0x20] sm:$0xff]  ;;  %s1757_s17 = sshll.u32 %s1874_s15, 3  ;;  %s316_s16 = scalar_lea.vmem [#allocation3], %s1628_s12 }
  0x33   : > { %1150 = vmatprep.subr.bf16.mxu1 %v1149_v5  ;;  %v1153_v14 = vpack.c.bf16 %v438_v12, %v436_v11  ;;  %v437_v15 = vld [vmem:[%s1642_s13 + $0x30] sm:$0xff]  ;;  %v347_v17 = vld [vmem:[%s1649_s9 + $0x18] sm:$0xff]  ;;  %v440_v20 = vld [vmem:[%s1642_s13 + $0x48] sm:$0xff]  ;;  %s1875_s11 = scalar_lea.vmem [#allocation5], %s1757_s17 }
  0x34   : > { %v346_v16 = vld [vmem:[%s1649_s9 + $0x10] sm:$0xff]  ;;  %1152 = vmatpush1.bf16.msra.mxu1 %v1151_v9  ;;  %1127 = vmatpush3.bf16.msra.mxu0 %v1126_v10  ;;  %v1155_v18 = vpack.c.bf16 %v437_v15, %v435_v13  ;;  %v442_v21 = vld [vmem:[%s1642_s13 + $0x58] sm:$0xff]  ;;  %v439_v22 = vld [vmem:[%s1642_s13 + $0x40] sm:$0xff] }
  0x35   : > { %v1129_v19 = vpack.c.bf16 %v347_v17, %v346_v16  ;;  %1154 = vmatprep.subr.bf16.mxu1 %v1153_v14  ;;  %1128 = vmatprep.subr.bf16.mxu0 %v1465_v0  ;;  %v1157_v23 = vpack.c.bf16 %v442_v21, %v440_v20  ;;  %v441_v24 = vld [vmem:[%s1642_s13 + $0x50] sm:$0xff]  ;;  %v348_v25 = vld [vmem:[%s1649_s9 + $0x20] sm:$0xff]  ;;  %v349_v26 = vld [vmem:[%s1649_s9 + $0x28] sm:$0xff] }
  0x36   : > { %v444_v27 = vld [vmem:[%s1642_s13 + $0x68] sm:$0xff]  ;;  %v446_v28 = vld [vmem:[%s1642_s13 + $0x78] sm:$0xff]  ;;  %v1159_v29 = vpack.c.bf16 %v441_v24, %v439_v22  ;;  %v1132_v30 = vpack.c.bf16 %v349_v26, %v348_v25  ;;  %v443_v31 = vld [vmem:[%s1642_s13 + $0x60] sm:$0xff] }
  0x37   : > { %v1161_v32 = vpack.c.bf16 %v446_v28, %v444_v27  ;;  %v445_v33 = vld [vmem:[%s1642_s13 + $0x70] sm:$0xff]  ;;  %v351_v35 = vld [vmem:[%s1649_s9 + $0x38] sm:$0xff]  ;;  %v448_v36 = vld [vmem:[%s1642_s13 + $0x88] sm:$0xff] }
  0x38   : > { %1156 = vmatpush1.bf16.msra.mxu1 %v1155_v18  ;;  %1130 = vmatpush3.bf16.msra.mxu0 %v1129_v19  ;;  %v350_v34 = vld [vmem:[%s1649_s9 + $0x30] sm:$0xff]  ;;  %v450_v37 = vld [vmem:[%s1642_s13 + $0x98] sm:$0xff]  ;;  %v1163_v38 = vpack.c.bf16 %v445_v33, %v443_v31  ;;  %v447_v40 = vld [vmem:[%s1642_s13 + $0x80] sm:$0xff] }
  0x39   : > { %1158 = vmatprep.subr.bf16.mxu1 %v1157_v23  ;;  %1131 = vmatprep.subr.bf16.mxu0 %v1465_v0  ;;  %v1135_v39 = vpack.c.bf16 %v351_v35, %v350_v34  ;;  %v1165_v41 = vpack.c.bf16 %v450_v37, %v448_v36  ;;  %v449_v42 = vld [vmem:[%s1642_s13 + $0x90] sm:$0xff]  ;;  %v352_v43 = vld [vmem:[%s1649_s9 + $0x40] sm:$0xff]  ;;  %v353_v44 = vld [vmem:[%s1649_s9 + $0x48] sm:$0xff] }
  0x3a   : > { %v452_v45 = vld [vmem:[%s1642_s13 + $0xa8] sm:$0xff]  ;;  %v454_v46 = vld [vmem:[%s1642_s13 + $0xb8] sm:$0xff]  ;;  %v1167_v47 = vpack.c.bf16 %v449_v42, %v447_v40  ;;  %v1138_v48 = vpack.c.bf16 %v353_v44, %v352_v43  ;;  %v451_v49 = vld [vmem:[%s1642_s13 + $0xa0] sm:$0xff] }
  0x3b   : > { %v1169_v50 = vpack.c.bf16 %v454_v46, %v452_v45  ;;  %v453_v51 = vld [vmem:[%s1642_s13 + $0xb0] sm:$0xff]  ;;  %v355_v53 = vld [vmem:[%s1649_s9 + $0x58] sm:$0xff]  ;;  %v456_v54 = vld [vmem:[%s1642_s13 + $0xc8] sm:$0xff] }
  0x3c   : > { %1160 = vmatpush1.bf16.msra.mxu1 %v1159_v29  ;;  %1133 = vmatpush3.bf16.msra.mxu0 %v1132_v30  ;;  %v354_v52 = vld [vmem:[%s1649_s9 + $0x50] sm:$0xff]  ;;  %v458_v55 = vld [vmem:[%s1642_s13 + $0xd8] sm:$0xff]  ;;  %v1171_v56 = vpack.c.bf16 %v453_v51, %v451_v49  ;;  %v455_v58 = vld [vmem:[%s1642_s13 + $0xc0] sm:$0xff] }
  0x3d   : > { %1162 = vmatprep.subr.bf16.mxu1 %v1161_v32  ;;  %1134 = vmatprep.subr.bf16.mxu0 %v1465_v0  ;;  %v1141_v57 = vpack.c.bf16 %v355_v53, %v354_v52  ;;  %v1173_v59 = vpack.c.bf16 %v458_v55, %v456_v54  ;;  %v457_v60 = vld [vmem:[%s1642_s13 + $0xd0] sm:$0xff]  ;;  %v356_v61 = vld [vmem:[%s1649_s9 + $0x60] sm:$0xff]  ;;  %v357_v62 = vld [vmem:[%s1649_s9 + $0x68] sm:$0xff]  ;;  %v1468_v55 = vmov (!%p994_p6), 0.0  }
  0x3e   : > { %v460_v63 = vld [vmem:[%s1642_s13 + $0xe8] sm:$0xff]  ;;  %v462_v2 = vld [vmem:[%s1642_s13 + $0xf8] sm:$0xff]  ;;  %v1175_v3 = vpack.c.bf16 %v457_v60, %v455_v58  ;;  %v1144_v4 = vpack.c.bf16 %v357_v62, %v356_v61  ;;  %v459_v5 = vld [vmem:[%s1642_s13 + $0xe0] sm:$0xff]  ;;  %780 = vst [vmem:[#allocation2] sm:$0xff] (!%p994_p6), %v1468_v55 }
  0x3f   : > { %v1177_v6 = vpack.c.bf16 %v462_v2, %v460_v63  ;;  %v461_v7 = vld [vmem:[%s1642_s13 + $0xf0] sm:$0xff]  ;;  %v359_v9 = vld [vmem:[%s1649_s9 + $0x78] sm:$0xff]  ;;  %v343_v12 = vld [vmem:[%s327_s20] sm:$0xff] }
  0x40   : > { %1164 = vmatpush1.bf16.msra.mxu1 %v1163_v38  ;;  %1136 = vmatpush3.bf16.msra.mxu0 %v1135_v39  ;;  %v358_v8 = vld [vmem:[%s1649_s9 + $0x70] sm:$0xff]  ;;  %v1179_v10 = vpack.c.bf16 %v461_v7, %v459_v5  ;;  %v691_v26 = vld [vmem:[%s1729_s30 + $0x8] sm:$0xff]  ;;  %v693_v29 = vld [vmem:[%s1729_s30 + $0x18] sm:$0xff] }
  0x41   : > { %1166 = vmatprep.subr.bf16.mxu1 %v1165_v41  ;;  %1137 = vmatprep.subr.bf16.mxu0 %v1465_v0  ;;  %v1147_v11 = vpack.c.bf16 %v359_v9, %v358_v8  ;;  %v692_v27 = vld [vmem:[%s1729_s30 + $0x10] sm:$0xff]  ;;  %v694_v31 = vld [vmem:[%s1729_s30 + $0x20] sm:$0xff]  ;;  %v695_v32 = vld [vmem:[%s1729_s30 + $0x28] sm:$0xff] }
  0x42   : > { %v1185_v30 = vpack.c.bf16 %v693_v29, %v692_v27  ;;  %v1188_v33 = vpack.c.bf16 %v695_v32, %v694_v31  ;;  %v696_v34 = vld [vmem:[%s1729_s30 + $0x30] sm:$0xff]  ;;  %v697_v35 = vld [vmem:[%s1729_s30 + $0x38] sm:$0xff]  ;;  %v698_v37 = vld [vmem:[%s1729_s30 + $0x40] sm:$0xff] }
  0x43   : > { %v1191_v36 = vpack.c.bf16 %v697_v35, %v696_v34  ;;  %v699_v38 = vld [vmem:[%s1729_s30 + $0x48] sm:$0xff]  ;;  %v700_v40 = vld [vmem:[%s1729_s30 + $0x50] sm:$0xff]  ;;  %v701_v41 = vld [vmem:[%s1729_s30 + $0x58] sm:$0xff] }
  0x44   : > { %1168 = vmatpush1.bf16.msra.mxu1 %v1167_v47  ;;  %1139 = vmatpush3.bf16.msra.mxu0 %v1138_v48  ;;  %v1194_v39 = vpack.c.bf16 %v699_v38, %v698_v37  ;;  %v1197_v42 = vpack.c.bf16 %v701_v41, %v700_v40  ;;  %v702_v43 = vld [vmem:[%s1729_s30 + $0x60] sm:$0xff]  ;;  %v703_v44 = vld [vmem:[%s1729_s30 + $0x68] sm:$0xff]  ;;  %v704_v46 = vld [vmem:[%s1729_s30 + $0x70] sm:$0xff] }
  0x45   : > { %1170 = vmatprep.subr.bf16.mxu1 %v1169_v50  ;;  %1140 = vmatprep.subr.bf16.mxu0 %v1465_v0  ;;  %v1200_v45 = vpack.c.bf16 %v703_v44, %v702_v43  ;;  %v705_v47 = vld [vmem:[%s1729_s30 + $0x78] sm:$0xff] }
  0x46   : > { %v1203_v48 = vpack.c.bf16 %v705_v47, %v704_v46 }
  0x48   : > { %1172 = vmatpush1.bf16.msra.mxu1 %v1171_v56  ;;  %1142 = vmatpush3.bf16.msra.mxu0 %v1141_v57 }
  0x49   : > { %1174 = vmatprep.subr.bf16.mxu1 %v1173_v59  ;;  %1143 = vmatprep.subr.bf16.mxu0 %v1465_v0 }
  0x4c   : > { %1176 = vmatpush1.bf16.msra.mxu1 %v1175_v3  ;;  %1145 = vmatpush3.bf16.msra.mxu0 %v1144_v4 }
  0x4d   : > { %1178 = vmatprep.subr.bf16.mxu1 %v1177_v6  ;;  %1146 = vmatprep.subr.bf16.mxu0 %v1465_v0 }
  0x50   : > { %1180 = vmatpush1.bf16.msra.mxu1 %v1179_v10  ;;  %1148 = vmatpush3.bf16.msra.mxu0 %v1147_v11 }
  0x51   : > { %1080 = vmatprep.subr.mxu1 %v1466_v1  ;;  %1181 = vmatprep.subr.bf16.mxu0 %v1465_v0 }
  0x53   : > { %528 = vmatmul.mubr.f32.vlgmr.msra.gmra.mrb[0].mxu1 %v343_v12  ;;  %1078 = vmatmul.mubr.f32.vlgmr.msra.gmra.mrb[0].mxu0 %v343_v12 }
  0x54   : > { %1082 = vmatprep.mubr.msk.f32.mxu1 %vm1467_vm0, %v1466_v1  ;;  %1122 = vmatprep.mubr.msk.f32.mxu0 %vm1467_vm0, %v1466_v1 }
 0x126   : > { %v529_v13 = vpop.f32.mrb[0].mxu1  ;;  %v426_v14 = vpop.f32.mrb[0].mxu0 }
 0x127   : > { %v430_v15 = vmul.f32 0.125, %v426_v14  ;;  %v531_v16 = vpop.f32.mrb[1].mxu1  ;;  %1081 = vmatpush3.xpose.msra.mxu1 %v529_v13  ;;  %v1079_v17 = vpop.f32.mrb[1].mxu0 }
 0x128   : > { %1085 = vmatprep.subr.mxu1 %v1466_v1 }
 0x12a   : > { %1083 = vmatmul.mubr.f32.vlgmr.msra.gmra.mrb[2].mxu1 %v430_v15 }
 0x12b   : > { %1086 = vmatpush3.msra.mxu1 %v531_v16  ;;  %1087 = vmatprep.mubr.msk.f32.mxu1 %vm1467_vm0, %v1466_v1  ;;  %v690_v1 = vld [vmem:[%s1729_s30] sm:$0xff] }
 0x12c   : > { %v1182_v28 = vpack.c.bf16 %v691_v26, %v690_v1 }
 0x12e   : > { %1183 = vmatpush3.bf16.msra.mxu0 %v1182_v28 }
 0x12f   : > { %1184 = vmatprep.subr.bf16.mxu0 %v1465_v0 }
 0x132   : > { %1186 = vmatpush3.bf16.msra.mxu0 %v1185_v30 }
 0x133   : > { %1187 = vmatprep.subr.bf16.mxu0 %v1465_v0 }
 0x136   : > { %1189 = vmatpush3.bf16.msra.mxu0 %v1188_v33 }
 0x137   : > { %1190 = vmatprep.subr.bf16.mxu0 %v1465_v0 }
 0x13a   : > { %1192 = vmatpush3.bf16.msra.mxu0 %v1191_v36 }
 0x13b   : > { %1193 = vmatprep.subr.bf16.mxu0 %v1465_v0 }
 0x13e   : > { %1195 = vmatpush3.bf16.msra.mxu0 %v1194_v39 }
 0x13f   : > { %1196 = vmatprep.subr.bf16.mxu0 %v1465_v0 }
 0x142   : > { %1198 = vmatpush3.bf16.msra.mxu0 %v1197_v42 }
 0x143   : > { %1199 = vmatprep.subr.bf16.mxu0 %v1465_v0 }
 0x146   : > { %1201 = vmatpush3.bf16.msra.mxu0 %v1200_v45 }
 0x147   : > { %1202 = vmatprep.subr.bf16.mxu0 %v1465_v0 }
 0x14a   : > { %1204 = vmatpush3.bf16.msra.mxu0 %v1203_v48 }
 0x1fd   : > { %v600_v18 = vpop.f32.mrb[2].mxu1 }
 0x1fe   : > { %v1084_v19 = vpop.f32.mrb[3].mxu1  ;;  %v605_v20 = vsel %vm604_vm1, %v600_v18, -inf }
 0x1ff   : > { %606 = vmax.xlane.f32.xlu0 %v605_v20 }
 0x28c   : > { %v607_v21 = vpop.xlane.xlu0 %606 }
 0x28d   : > { %v608_v22 = vsub.f32 %v600_v18, %v607_v21 }
 0x28f   : > { %v609_v23 = vmul.f32 1.442695, %v608_v22 }
 0x291   : > { %1309 = vpow2.f32 %v609_v23 }
 0x29b   : > { %v1310_v24 = vpop.eup %1309 }
 0x29c   : > { %v611_v25 = vsel %vm604_vm1, %v1310_v24, 0.0 }
 0x29d   : > { %612 = vadd.xlane.f32.xlu0 %v611_v25 }
 0x32a   : > { %v613_v49 = vpop.xlane.xlu0 %612 }
 0x32b   : > { %1311 = vrcp.f32 %v613_v49 }
 0x335   : > { %v1312_v50 = vpop.eup %1311 }
 0x336   : > { %v615_v51 = vmul.f32 %v1312_v50, %v1310_v24 }
 0x338   : > { %616 = vst.msk [vmem:[%s1875_s11] sm:$0xff] %vm604_vm1, %v615_v51  ;;  %1088 = vmatmul.mubr.msk.f32.vlgmr.msra.gmra.mrb[4].mxu1 %vm604_vm1, %v615_v51 }
 0x40b   : > { %v686_v52 = vpop.f32.mrb[4].mxu1 }
 0x40c   : > { %v1089_v0 = vpop.f32.mrb[5].mxu1  ;;  %1123 = vmatmul.mubr.f32.vlgmr.msra.gmra.mrb[2].mxu0 %v686_v52 }
 0x4da   : > { %779 = sbr.rel (%p994_p6) target bundleno = 1249 (0x4e1), region = 44 }
 0x4df   : > { %v772_v53 = vpop.f32.mrb[2].mxu0 }
 0x4e0   : > { %v1124_v54 = vpop.f32.mrb[3].mxu0 }
 0x4e1 PF: > { %v781_v56 = vld [vmem:[#allocation2] sm:$0xff]  ;;  %p995_p8 = scmp.ne.s32.totalorder %s1447_s27, 7 }
 0x4e2   : > { %v782_v57 = vadd.f32 %v781_v56, %v772_v53  ;;  %v996_v59 = vld [vmem:[%s1866_s4] ss:$0 sm:$0xff] (!%p995_p8) }
 0x4e3   : > { %787 = sbr.rel (%p995_p8) target bundleno = 1263 (0x4ef), region = 48 }
 0x4e4   : > { %783 = vst [vmem:[#allocation2] sm:$0xff] %v782_v57 }
 0x4eb   : > { %v788_v58 = vld [vmem:[#allocation2] sm:$0xff] }
 0x4ec   : > { %v796_v60 = vadd.f32 %v996_v59, %v788_v58 }
 0x4ee   : > { %797 = vst [vmem:[%s316_s16] sm:$0xff] %v796_v60 }
 0x4ef PF: > { %s999_s12 = sshll.u32 %s1451_s28, 7  ;;  %s818_s15 = sshll.u32 %s316_s16, 4  ;;  %s819_s15 = int_to_ptr.vmem [resolvable:$true] %s818_s15 }
 0x4f0   : > { %s1774_s30 = scalar_lea.hbm %s1867_s5, %s999_s12  ;;  %s1895_s11 = sand.u32 1, %s1439_s25  }
 0x4f1   : > { %s799_s0 = scalar_lea.sflag [#allocation4], %s1895_s11  ;;  %s1313_s1 = scalar_lea.vmem %s819_s15, 128 }
 0x4f2   : > { %p1314_p9 = scmp.ne.s32.totalorder %s819_s15, %s1313_s1  ;;  %s1469_s19 = smov [#allocation3]  }
 0x4f3   : > { %s1317_s20 = sshll.u32 %s1469_s19, 4  ;;  %s1318_s20 = int_to_ptr.vmem [resolvable:$false] %s1317_s20 }
 0x4f4   : > { %p1315_p10 = pnand %p1314_p9, %p1577_p3  ;;  %s1319_s2 = scalar_lea.vmem %s1318_s20, 256 }
 0x4f5   : > { %p1320_p0 = scmp.lt.s32.totalorder %s819_s15, %s1318_s20  ;;  %p1321_p1 = scmp.lt.s32.totalorder %s1319_s2, %s1313_s1 }
 0x4f6   : > { %p1316_p11 = pneg %p1315_p10 }
 0x4f7   : > { %p1322_p4 = por %p1321_p1, %p1320_p0 }
 0x4f9   : > { %p1323_p2 = pnand %p1322_p4, %p1316_p11 }
 0x4fb   : > { %1326 = shalt.err (!%p1323_p2)
}
 0x4fc   : > { %s1327_s11 = scalar_lea.hbm %s1774_s30, 128  ;;  %s1331_s9 = scalar_lea.hbm %s1867_s5, 256 }
 0x4fd   : > { %p1328_p5 = scmp.ne.s32.totalorder %s1774_s30, %s1327_s11  ;;  %p1332_p9 = scmp.lt.u32.totalorder %s1774_s30, %s1867_s5 }
 0x4fe   : > { %p1333_p10 = scmp.lt.u32.totalorder %s1331_s9, %s1327_s11  ;;  %p1335_p0 = scmp.lt.u32.totalorder %s1327_s11, %s1774_s30 }
 0x4ff   : > { %p1329_p6 = pnand %p1328_p5, %p1577_p3 }
 0x500   : > { %p1334_p11 = por %p1333_p10, %p1332_p9 }
 0x501   : > { %p1330_p8 = pneg %p1329_p6 }
 0x502   : > { %p1336_p1 = por %p1335_p0, %p1334_p11 }
 0x504   : > { %p1337_p4 = pnand %p1336_p1, %p1330_p8 }
 0x506   : > { %1340 = shalt.err (!%p1337_p4)
}
 0x507   : > { %1205 = dma.vmem_to_hbm [thread:$0]  (%p1577_p3), %s819_s15, 128, %s1774_s30, %s799_s0  }
 0x508   : > { %s1000_s1 = sshll.u32 %s1451_s28, 3  ;;  %s1896_s2 = scalar_lea.vmem [#allocation5], %s1757_s17 }
 0x509   : > { %s834_s20 = sshll.u32 %s1896_s2, 4  ;;  %s830_s16 = sadd.s32 %s1447_s27, %s1000_s1  ;;  %s1799_s20 = int_to_ptr.vmem [resolvable:$true] %s834_s20 }
 0x50a   : > { %s1001_s11 = sshll.u32 %s830_s16, 7  ;;  %s1897_s13 = sand.u32 1, %s1427_s22  }
 0x50b   : > { %s832_s14 = scalar_lea.hbm %s1868_s6, %s1001_s11  ;;  %s804_s19 = scalar_lea.sflag [#allocation6], %s1897_s13 }
 0x50c   : > { %s1341_s3 = scalar_lea.vmem %s1799_s20, 128  ;;  %s1470_s0 = smov [#allocation5]  }
 0x50d   : > { %p1342_p2 = scmp.ne.s32.totalorder %s1799_s20, %s1341_s3  ;;  %s1345_s28 = sshll.u32 %s1470_s0, 4  ;;  %s1346_s28 = int_to_ptr.vmem [resolvable:$false] %s1345_s28 }
 0x50e   : > { %s1347_s27 = scalar_lea.vmem %s1346_s28, 256  ;;  %p1348_p6 = scmp.lt.s32.totalorder %s1799_s20, %s1346_s28 }
 0x50f   : > { %p1343_p3 = pnand %p1342_p2, %p1606_p12  ;;  %p1349_p8 = scmp.lt.s32.totalorder %s1347_s27, %s1341_s3 }
 0x511   : > { %p1344_p5 = pneg %p1343_p3  ;;  %p1350_p9 = por %p1349_p8, %p1348_p6 }
 0x513   : > { %p1351_p10 = pnand %p1350_p9, %p1344_p5 }
 0x515   : > { %1354 = shalt.err (!%p1351_p10)
}
 0x516   : > { %s1355_s15 = scalar_lea.hbm %s832_s14, 128  ;;  %s1359_s1 = scalar_lea.hbm %s1868_s6, 2048 }
 0x517   : > { %p1356_p11 = scmp.ne.s32.totalorder %s832_s14, %s1355_s15  ;;  %p1360_p4 = scmp.lt.u32.totalorder %s832_s14, %s1868_s6 }
 0x518   : > { %p1361_p2 = scmp.lt.u32.totalorder %s1359_s1, %s1355_s15  ;;  %p1363_p13 = scmp.lt.u32.totalorder %s1355_s15, %s832_s14 }
 0x519   : > { %p1357_p0 = pnand %p1356_p11, %p1606_p12 }
 0x51a   : > { %p1362_p3 = por %p1361_p2, %p1360_p4 }
 0x51b   : > { %p1358_p1 = pneg %p1357_p0 }
 0x51c   : > { %p1364_p6 = por %p1363_p13, %p1362_p3 }
 0x51e   : > { %p1365_p5 = pnand %p1364_p6, %p1358_p1 }
 0x520   : > { %1368 = shalt.err (!%p1365_p5)
}
 0x521   : > { %1206 = dma.vmem_to_hbm [thread:$0]  (%p1606_p12), %s1799_s20, 128, %s832_s14, %s804_s19  }
 0x522 PF: > { %p1216_p8 = scmp.ge.s32.totalorder %s1463_s7, 2  ;;  %s846_s3 = sand.u32 1, %s1435_s24  }
 0x523   : > { %s847_s11 = scalar_lea.sflag [#allocation4], %s846_s3 }
 0x524   : > { %p1210_p9 = pnand %p1216_p8, %p1594_p7 }
 0x526   : > { %1414 = dma.done.wait (!%p1210_p9), %s847_s11, 128  }
 0x527   : > { %1416 = vsyncadd (!%p1210_p9), %s847_s11, 4294967168  ;;  %s855_s12 = sand.u32 1, %s1423_s21   ;;  %p1898_p13 = scmp.ne.s32.totalorder %s1890_s29, 0 }
 0x528   : > { %s856_s9 = scalar_lea.sflag [#allocation6], %s855_s12 }
 0x529   : > { %p1213_p10 = pnand %p1216_p8, %p1898_p13 }
 0x52b   : > { %1418 = dma.done.wait (!%p1213_p10), %s856_s9, 128  }
 0x52c   : > { %1420 = vsyncadd (!%p1213_p10), %s856_s9, 4294967168  ;;  %s23_s7 = sadd.s32 1, %s1463_s7   ;;  %s1899_s18 = sld [smem:[#allocation13_spill]] }
 0x52d   : > { %p20_p12 = scmp.ge.s32.totalorder %s23_s7, 18   ;;  %s1900_s27 = sld [smem:[#allocation9_spill]] }
 0x52e   : > { %s1901_s28 = sld [smem:[#allocation10_spill]]  ;;  %s1902_s29 = sld [smem:[#allocation11_spill]] }
 0x52f   : > { %s1903_s30 = sld [smem:[#allocation12_spill]]  ;;  %s1904_s21 = smov %s1427_s22 }
 0x530   : > { %s1905_s22 = smov %s1431_s23  ;;  %s1906_s23 = smov %s1614_s10 }
 0x531   : > { %s1907_s24 = smov %s1439_s25  ;;  %s1908_s25 = smov %s1443_s26 }
 0x532   : > { %s1909_s26 = smov %s1899_s18  ;;  %22 = sbr.rel (!%p20_p12) target bundleno = 14 (0xe), region = 109 }
 0x539   :  { %861 = vsyncpa [#allocation4], 1 }
 0x53a   :  { %863 = vsyncpa [#allocation4 + $0x1], 1 }
 0x53b   :  { %864 = vsyncpa [#allocation6], 1 }
 0x53c   :  { %866 = vsyncpa [#allocation6 + $0x1], 1 }

</bundles_post_ra>
